<compile_context>
chip_gen: v7x
topology: tpu7x:2x2x1
jax: 0.10.0
libtpu: 0.0.40
codegen_flags: <defaults>
</compile_context>

<pallas_src>
import jax
import jax.numpy as jnp
from jax.experimental import pallas as pl
from jax.experimental.pallas import tpu as pltpu


def _resblock1d_kernel(x_ref, w1_ref, b1_ref, w2_ref, b2_ref, w3_ref, b3_ref,
                       o_ref):
    # Block shapes:
    #   x_ref : (1, Cin, L)     w1_ref: (Cmid, Cin)    b1_ref: (Cmid, 1)
    #   w2_ref: (3, Cmid, Cmid) b2_ref: (Cmid, 1)
    #   w3_ref: (Cout, Cmid)    b3_ref: (Cout, 1)
    #   o_ref : (1, Cout, L)    with Cout == Cin (identity path, no downsample)
    x = x_ref[0]                                               # (Cin, L)

    # conv1 (1x1) + folded BN1 + ReLU  ->  (Cmid, L), lane-dense in L.
    h1 = jnp.dot(w1_ref[...], x, preferred_element_type=jnp.float32)
    h1 = jnp.maximum(h1 + b1_ref[...], 0.0)

    # conv2 (k=3, stride=1, padding=1) + folded BN2 + ReLU.
    # Shifted copies of h1 via XLU lane rotation; zero the wrapped column to
    # emulate the zero padding.
    c_mid, length = h1.shape
    lane = jax.lax.broadcasted_iota(jnp.int32, (c_mid, length), 1)
    h1_prev = jnp.where(lane == 0, 0.0, pltpu.roll(h1, shift=1, axis=1))
    h1_next = jnp.where(lane == length - 1, 0.0,
                        pltpu.roll(h1, shift=length - 1, axis=1))
    h2 = (jnp.dot(w2_ref[0], h1_prev, preferred_element_type=jnp.float32)
          + jnp.dot(w2_ref[1], h1, preferred_element_type=jnp.float32)
          + jnp.dot(w2_ref[2], h1_next, preferred_element_type=jnp.float32))
    h2 = jnp.maximum(h2 + b2_ref[...], 0.0)

    # conv3 (1x1) + folded BN3, residual add (identity = x), final ReLU.
    h3 = jnp.dot(w3_ref[...], h2, preferred_element_type=jnp.float32)
    h3 = h3 + b3_ref[...]
    o_ref[0] = jnp.maximum(h3 + x, 0.0).astype(o_ref.dtype)


def _fold_bn(conv_w, conv_b, gamma, beta, mean, var, eps):
    # Eval-mode BN after a conv:  y = scale*(W x + b - mean) + beta
    #                              = (scale*W) x + (scale*(b - mean) + beta)
    scale = gamma * jax.lax.rsqrt(var + eps)                   # (Cout,)
    w_eff = conv_w * scale[:, None, None]
    b_eff = scale * (conv_b - mean) + beta
    return w_eff, b_eff


def res_block_1d(x, params, *, eps=1e-5, vmem_limit_bytes=32 * 1024 * 1024):
    """Forward pass of ResBlock_1D (stride=1, identity_downsample=None,
    BatchNorm folded in eval mode).  x: (N, Cin, L) float32, NCL layout."""
    n, c_in, length = x.shape
    c_mid = params["conv1_w"].shape[0]
    c_out = params["conv3_w"].shape[0]
    assert c_out == c_in, "identity path requires in_channels == out_channels*4"

    # Host-side BN folding (weights are tiny; activations untouched).
    w1, b1 = _fold_bn(params["conv1_w"], params["conv1_b"], params["bn1_g"],
                      params["bn1_b"], params["bn1_m"], params["bn1_v"], eps)
    w2, b2 = _fold_bn(params["conv2_w"], params["conv2_b"], params["bn2_g"],
                      params["bn2_b"], params["bn2_m"], params["bn2_v"], eps)
    w3, b3 = _fold_bn(params["conv3_w"], params["conv3_b"], params["bn3_g"],
                      params["bn3_b"], params["bn3_m"], params["bn3_v"], eps)

    w1_mat = w1[:, :, 0]                                  # (Cmid, Cin)
    w2_taps = jnp.transpose(w2, (2, 0, 1))                # (3, Cmid, Cmid)
    w3_mat = w3[:, :, 0]                                  # (Cout, Cmid)
    b1_col, b2_col, b3_col = b1[:, None], b2[:, None], b3[:, None]

    flops = 2 * n * length * (c_in * c_mid + 3 * c_mid * c_mid + c_mid * c_out)
    bytes_accessed = 4 * (n * c_in * length + n * c_out * length
                          + w1_mat.size + w2_taps.size + w3_mat.size
                          + b1.size + b2.size + b3.size)

    const2 = lambda i: (0, 0)
    const3 = lambda i: (0, 0, 0)

    return pl.pallas_call(
        _resblock1d_kernel,
        out_shape=jax.ShapeDtypeStruct((n, c_out, length), x.dtype),
        grid_spec=pltpu.PrefetchScalarGridSpec(
            num_scalar_prefetch=0,
            grid=(n,),
            in_specs=[
                pl.BlockSpec((1, c_in, length), lambda i: (i, 0, 0)),
                pl.BlockSpec((c_mid, c_in), const2),      # weights: resident
                pl.BlockSpec((c_mid, 1), const2),
                pl.BlockSpec((3, c_mid, c_mid), const3),
                pl.BlockSpec((c_mid, 1), const2),
                pl.BlockSpec((c_out, c_mid), const2),
                pl.BlockSpec((c_out, 1), const2),
            ],
            out_specs=pl.BlockSpec((1, c_out, length), lambda i: (i, 0, 0)),
        ),
        compiler_params=pltpu.CompilerParams(
            dimension_semantics=("parallel",),
            vmem_limit_bytes=vmem_limit_bytes,
        ),
        cost_estimate=pl.CostEstimate(
            flops=flops, transcendentals=0, bytes_accessed=bytes_accessed),
    )(x, w1_mat, b1_col, w2_taps, b2_col, w3_mat, b3_col)


def init_params(key, in_channels, mid_channels, expansion=4):
    """Deterministic init mirroring nn.Conv1d defaults + randomized eval-mode
    BN statistics/affine (so the BN fold is actually exercised)."""
    out_channels = mid_channels * expansion
    keys = jax.random.split(key, 12)

    def conv_init(kw, kb, c_out, c_in, ksize):
        bound = 1.0 / jnp.sqrt(jnp.float32(c_in * ksize))
        w = jax.random.uniform(kw, (c_out, c_in, ksize), jnp.float32,
                               -bound, bound)
        b = jax.random.uniform(kb, (c_out,), jnp.float32, -bound, bound)
        return w, b

    c1w, c1b = conv_init(keys[0], keys[1], mid_channels, in_channels, 1)
    c2w, c2b = conv_init(keys[2], keys[3], mid_channels, mid_channels, 3)
    c3w, c3b = conv_init(keys[4], keys[5], out_channels, mid_channels, 1)

    def bn_init(kg, km, c):
        g = 1.0 + 0.1 * jax.random.normal(kg, (c,), jnp.float32)
        b = 0.1 * jax.random.normal(jax.random.fold_in(kg, 1), (c,), jnp.float32)
        m = 0.1 * jax.random.normal(km, (c,), jnp.float32)
        v = 1.0 + 0.1 * jax.random.uniform(jax.random.fold_in(km, 1), (c,),
                                           jnp.float32)
        return g, b, m, v

    bn1 = bn_init(keys[6], keys[7], mid_channels)
    bn2 = bn_init(keys[8], keys[9], mid_channels)
    bn3 = bn_init(keys[10], keys[11], out_channels)

    return dict(
        conv1_w=c1w, conv1_b=c1b,
        bn1_g=bn1[0], bn1_b=bn1[1], bn1_m=bn1[2], bn1_v=bn1[3],
        conv2_w=c2w, conv2_b=c2b,
        bn2_g=bn2[0], bn2_b=bn2[1], bn2_m=bn2[2], bn2_v=bn2[3],
        conv3_w=c3w, conv3_b=c3b,
        bn3_g=bn3[0], bn3_b=bn3[1], bn3_m=bn3[2], bn3_v=bn3[3],
    )


def _reference(x, params, eps=1e-5):
    """Pure-JAX reference of the same math (eval-mode BN)."""
    def bn(h, g, b, m, v):
        s = (g * jax.lax.rsqrt(v + eps))[None, :, None]
        return (h - m[None, :, None]) * s + b[None, :, None]

    h = (jnp.einsum("ncl,oc->nol", x, params["conv1_w"][:, :, 0])
         + params["conv1_b"][None, :, None])
    h = jax.nn.relu(bn(h, params["bn1_g"], params["bn1_b"],
                       params["bn1_m"], params["bn1_v"]))

    length = x.shape[2]
    hp = jnp.pad(h, ((0, 0), (0, 0), (1, 1)))
    w2 = params["conv2_w"]
    h = sum(jnp.einsum("ncl,oc->nol", hp[:, :, t:t + length], w2[:, :, t])
            for t in range(3)) + params["conv2_b"][None, :, None]
    h = jax.nn.relu(bn(h, params["bn2_g"], params["bn2_b"],
                       params["bn2_m"], params["bn2_v"]))

    h = (jnp.einsum("ncl,oc->nol", h, params["conv3_w"][:, :, 0])
         + params["conv3_b"][None, :, None])
    h = bn(h, params["bn3_g"], params["bn3_b"],
           params["bn3_m"], params["bn3_v"])
    return jax.nn.relu(h + x)


if __name__ == "__main__":
    key = jax.random.PRNGKey(0)
    k_x, k_p = jax.random.split(key)

    batch, mid_channels, expansion, length = 2, 4, 4, 256
    in_channels = mid_channels * expansion          # identity path: Cin == Cout
    x = jax.random.normal(k_x, (batch, in_channels, length), jnp.float32)
    params = init_params(k_p, in_channels, mid_channels, expansion)

    y = jax.block_until_ready(res_block_1d(x, params))

    ref = _reference(x, params)
    assert y.shape == (batch, in_channels, length)
    assert jnp.allclose(y, ref, atol=1e-3, rtol=1e-3), (
        "mismatch vs reference, max abs err = %g"
        % float(jnp.max(jnp.abs(y - ref))))

    print("KERNEL_OK")
</pallas_src>

<mosaic_0001>
module attributes {stable_mosaic.version = 11 : i64} {
  func.func @_resblock1d_kernel(%arg0: i32, %arg1: memref<1x16x256xf32, #tpu.memory_space<vmem>>, %arg2: memref<4x16xf32, #tpu.memory_space<vmem>>, %arg3: memref<4x1xf32, #tpu.memory_space<vmem>>, %arg4: memref<3x4x4xf32, #tpu.memory_space<vmem>>, %arg5: memref<4x1xf32, #tpu.memory_space<vmem>>, %arg6: memref<16x4xf32, #tpu.memory_space<vmem>>, %arg7: memref<16x1xf32, #tpu.memory_space<vmem>>, %arg8: memref<1x16x256xf32, #tpu.memory_space<vmem>>) attributes {dimension_semantics = [#tpu.dimension_semantics<parallel>], iteration_bounds = array<i64: 2>, scalar_prefetch = 0 : i64, scratch_operands = 0 : i64, tpu.core_type = #tpu.core_type<tc>, window_params = [{transform_indices = @transform_0, window_bounds = array<i64: 1, 16, 256>}, {pipeline_mode = #tpu.pipeline_mode<synchronous>, transform_indices = @transform_1, window_bounds = array<i64: 4, 16>}, {pipeline_mode = #tpu.pipeline_mode<synchronous>, transform_indices = @transform_2, window_bounds = array<i64: 4, 1>}, {pipeline_mode = #tpu.pipeline_mode<synchronous>, transform_indices = @transform_3, window_bounds = array<i64: 3, 4, 4>}, {pipeline_mode = #tpu.pipeline_mode<synchronous>, transform_indices = @transform_4, window_bounds = array<i64: 4, 1>}, {pipeline_mode = #tpu.pipeline_mode<synchronous>, transform_indices = @transform_5, window_bounds = array<i64: 16, 4>}, {pipeline_mode = #tpu.pipeline_mode<synchronous>, transform_indices = @transform_6, window_bounds = array<i64: 16, 1>}, {transform_indices = @transform_7, window_bounds = array<i64: 1, 16, 256>}]} {
    %c0 = arith.constant 0 : index
    %c0_0 = arith.constant 0 : index
    %c0_1 = arith.constant 0 : index
    %0 = vector.load %arg1[%c0, %c0_0, %c0_1] : memref<1x16x256xf32, #tpu.memory_space<vmem>>, vector<1x16x256xf32>
    %1 = vector.shape_cast %0 : vector<1x16x256xf32> to vector<16x256xf32>
    %c0_2 = arith.constant 0 : index
    %c0_3 = arith.constant 0 : index
    %2 = vector.load %arg2[%c0_2, %c0_3] : memref<4x16xf32, #tpu.memory_space<vmem>>, vector<4x16xf32>
    %cst = arith.constant dense<0.000000e+00> : vector<4x256xf32>
    %3 = tpu.matmul %2, %1, %cst {dimension_numbers = #tpu.dot_dimension_numbers<[1], [0], [0], [1], [0, 0, 1, 1], [], []>} : vector<4x16xf32>, vector<16x256xf32>, vector<4x256xf32> -> vector<4x256xf32>
    %c0_4 = arith.constant 0 : index
    %c0_5 = arith.constant 0 : index
    %4 = vector.load %arg3[%c0_4, %c0_5] : memref<4x1xf32, #tpu.memory_space<vmem>>, vector<4x1xf32>
    %5 = vector.broadcast %4 : vector<4x1xf32> to vector<4x256xf32>
    %6 = arith.addf %3, %5 : vector<4x256xf32>
    %cst_6 = arith.constant 0.000000e+00 : f32
    %7 = vector.broadcast %cst_6 : f32 to vector<4x256xf32>
    %8 = arith.maximumf %6, %7 : vector<4x256xf32>
    %9 = tpu.iota {dimensions = array<i32: 1>} : vector<4x256xi32>
    %c0_i32 = arith.constant 0 : i32
    %10 = vector.broadcast %c0_i32 : i32 to vector<4x256xi32>
    %11 = arith.cmpi eq, %9, %10 : vector<4x256xi32>
    %c1_i32 = arith.constant 1 : i32
    %12 = tpu.dynamic_rotate %8 by %c1_i32 dim 1 : vector<4x256xf32>, i32 -> vector<4x256xf32>
    %cst_7 = arith.constant 0.000000e+00 : f32
    %13 = vector.broadcast %cst_7 : f32 to vector<4x256xf32>
    %14 = arith.select %11, %13, %12 : vector<4x256xi1>, vector<4x256xf32>
    %c255_i32 = arith.constant 255 : i32
    %15 = vector.broadcast %c255_i32 : i32 to vector<4x256xi32>
    %16 = arith.cmpi eq, %9, %15 : vector<4x256xi32>
    %c255_i32_8 = arith.constant 255 : i32
    %17 = tpu.dynamic_rotate %8 by %c255_i32_8 dim 1 : vector<4x256xf32>, i32 -> vector<4x256xf32>
    %cst_9 = arith.constant 0.000000e+00 : f32
    %18 = vector.broadcast %cst_9 : f32 to vector<4x256xf32>
    %19 = arith.select %16, %18, %17 : vector<4x256xi1>, vector<4x256xf32>
    %c0_10 = arith.constant 0 : index
    %c0_11 = arith.constant 0 : index
    %c0_12 = arith.constant 0 : index
    %20 = vector.load %arg4[%c0_10, %c0_11, %c0_12] : memref<3x4x4xf32, #tpu.memory_space<vmem>>, vector<1x4x4xf32>
    %21 = vector.shape_cast %20 : vector<1x4x4xf32> to vector<4x4xf32>
    %cst_13 = arith.constant dense<0.000000e+00> : vector<4x256xf32>
    %22 = tpu.matmul %21, %14, %cst_13 {dimension_numbers = #tpu.dot_dimension_numbers<[1], [0], [0], [1], [0, 0, 1, 1], [], []>} : vector<4x4xf32>, vector<4x256xf32>, vector<4x256xf32> -> vector<4x256xf32>
    %c1 = arith.constant 1 : index
    %c0_14 = arith.constant 0 : index
    %c0_15 = arith.constant 0 : index
    %23 = vector.load %arg4[%c1, %c0_14, %c0_15] : memref<3x4x4xf32, #tpu.memory_space<vmem>>, vector<1x4x4xf32>
    %24 = vector.shape_cast %23 : vector<1x4x4xf32> to vector<4x4xf32>
    %cst_16 = arith.constant dense<0.000000e+00> : vector<4x256xf32>
    %25 = tpu.matmul %24, %8, %cst_16 {dimension_numbers = #tpu.dot_dimension_numbers<[1], [0], [0], [1], [0, 0, 1, 1], [], []>} : vector<4x4xf32>, vector<4x256xf32>, vector<4x256xf32> -> vector<4x256xf32>
    %26 = arith.addf %22, %25 : vector<4x256xf32>
    %c2 = arith.constant 2 : index
    %c0_17 = arith.constant 0 : index
    %c0_18 = arith.constant 0 : index
    %27 = vector.load %arg4[%c2, %c0_17, %c0_18] : memref<3x4x4xf32, #tpu.memory_space<vmem>>, vector<1x4x4xf32>
    %28 = vector.shape_cast %27 : vector<1x4x4xf32> to vector<4x4xf32>
    %cst_19 = arith.constant dense<0.000000e+00> : vector<4x256xf32>
    %29 = tpu.matmul %28, %19, %cst_19 {dimension_numbers = #tpu.dot_dimension_numbers<[1], [0], [0], [1], [0, 0, 1, 1], [], []>} : vector<4x4xf32>, vector<4x256xf32>, vector<4x256xf32> -> vector<4x256xf32>
    %30 = arith.addf %26, %29 : vector<4x256xf32>
    %c0_20 = arith.constant 0 : index
    %c0_21 = arith.constant 0 : index
    %31 = vector.load %arg5[%c0_20, %c0_21] : memref<4x1xf32, #tpu.memory_space<vmem>>, vector<4x1xf32>
    %32 = vector.broadcast %31 : vector<4x1xf32> to vector<4x256xf32>
    %33 = arith.addf %30, %32 : vector<4x256xf32>
    %cst_22 = arith.constant 0.000000e+00 : f32
    %34 = vector.broadcast %cst_22 : f32 to vector<4x256xf32>
    %35 = arith.maximumf %33, %34 : vector<4x256xf32>
    %c0_23 = arith.constant 0 : index
    %c0_24 = arith.constant 0 : index
    %36 = vector.load %arg6[%c0_23, %c0_24] : memref<16x4xf32, #tpu.memory_space<vmem>>, vector<16x4xf32>
    %cst_25 = arith.constant dense<0.000000e+00> : vector<16x256xf32>
    %37 = tpu.matmul %36, %35, %cst_25 {dimension_numbers = #tpu.dot_dimension_numbers<[1], [0], [0], [1], [0, 0, 1, 1], [], []>} : vector<16x4xf32>, vector<4x256xf32>, vector<16x256xf32> -> vector<16x256xf32>
    %c0_26 = arith.constant 0 : index
    %c0_27 = arith.constant 0 : index
    %38 = vector.load %arg7[%c0_26, %c0_27] : memref<16x1xf32, #tpu.memory_space<vmem>>, vector<16x1xf32>
    %39 = vector.broadcast %38 : vector<16x1xf32> to vector<16x256xf32>
    %40 = arith.addf %37, %39 : vector<16x256xf32>
    %41 = arith.addf %40, %1 : vector<16x256xf32>
    %cst_28 = arith.constant 0.000000e+00 : f32
    %42 = vector.broadcast %cst_28 : f32 to vector<16x256xf32>
    %43 = arith.maximumf %41, %42 : vector<16x256xf32>
    %c0_29 = arith.constant 0 : index
    %c0_30 = arith.constant 0 : index
    %c0_31 = arith.constant 0 : index
    %44 = vector.load %arg8[%c0_29, %c0_30, %c0_31] : memref<1x16x256xf32, #tpu.memory_space<vmem>>, vector<1x16x256xf32>
    %45 = vector.shape_cast %44 : vector<1x16x256xf32> to vector<16x256xf32>
    %46 = vector.shape_cast %43 : vector<16x256xf32> to vector<1x16x256xf32>
    tpu.vector_store %arg8[%c0_29, %c0_30, %c0_31], %46 {strides = array<i32>} : memref<1x16x256xf32, #tpu.memory_space<vmem>>, vector<1x16x256xf32>,
    return
  }
  func.func @transform_0(%arg0: i32) -> (i32, i32, i32) {
    %c0_i32 = arith.constant 0 : i32
    %c0_i32_0 = arith.constant 0 : i32
    %c0_i32_1 = arith.constant 0 : i32
    return %arg0, %c0_i32, %c0_i32_0 : i32, i32, i32
  }
  func.func @transform_1(%arg0: i32) -> (i32, i32) {
    %c0_i32 = arith.constant 0 : i32
    %c0_i32_0 = arith.constant 0 : i32
    %c0_i32_1 = arith.constant 0 : i32
    return %c0_i32, %c0_i32_0 : i32, i32
  }
  func.func @transform_2(%arg0: i32) -> (i32, i32) {
    %c0_i32 = arith.constant 0 : i32
    %c0_i32_0 = arith.constant 0 : i32
    %c0_i32_1 = arith.constant 0 : i32
    return %c0_i32, %c0_i32_0 : i32, i32
  }
  func.func @transform_3(%arg0: i32) -> (i32, i32, i32) {
    %c0_i32 = arith.constant 0 : i32
    %c0_i32_0 = arith.constant 0 : i32
    %c0_i32_1 = arith.constant 0 : i32
    %c0_i32_2 = arith.constant 0 : i32
    return %c0_i32, %c0_i32_0, %c0_i32_1 : i32, i32, i32
  }
  func.func @transform_4(%arg0: i32) -> (i32, i32) {
    %c0_i32 = arith.constant 0 : i32
    %c0_i32_0 = arith.constant 0 : i32
    %c0_i32_1 = arith.constant 0 : i32
    return %c0_i32, %c0_i32_0 : i32, i32
  }
  func.func @transform_5(%arg0: i32) -> (i32, i32) {
    %c0_i32 = arith.constant 0 : i32
    %c0_i32_0 = arith.constant 0 : i32
    %c0_i32_1 = arith.constant 0 : i32
    return %c0_i32, %c0_i32_0 : i32, i32
  }
  func.func @transform_6(%arg0: i32) -> (i32, i32) {
    %c0_i32 = arith.constant 0 : i32
    %c0_i32_0 = arith.constant 0 : i32
    %c0_i32_1 = arith.constant 0 : i32
    return %c0_i32, %c0_i32_0 : i32, i32
  }
  func.func @transform_7(%arg0: i32) -> (i32, i32, i32) {
    %c0_i32 = arith.constant 0 : i32
    %c0_i32_0 = arith.constant 0 : i32
    %c0_i32_1 = arith.constant 0 : i32
    return %arg0, %c0_i32, %c0_i32_0 : i32, i32, i32
  }
}

</mosaic_0001>

<bundles_post_ra>
// kernel: tpu_custom_call.1
= control target key start
LH: loop header
LB: loop body
LE: loop exit
PB: predicated region body
PF: predicated region fallthrough
CT: control target
= control target key end

     0   :  { %12 = vsyncpa [#allocation3], 0  ;;  %s1346_s0 = inlined_call_operand.hbm [shape: f32[2,16,256], index: 0, kind: input, shape index: {}]   ;;  %s1347_s1 = inlined_call_operand.vmem [shape: f32[4,16], index: 1, kind: input, shape index: {}]   ;;  %s1348_s2 = inlined_call_operand.vmem [shape: f32[4,1], index: 2, kind: input, shape index: {}]   ;;  %s1349_s3 = inlined_call_operand.vmem [shape: f32[3,4,4], index: 3, kind: input, shape index: {}]   ;;  %s1350_s4 = inlined_call_operand.vmem [shape: f32[4,1], index: 4, kind: input, shape index: {}]   ;;  %s1351_s5 = inlined_call_operand.vmem [shape: f32[16,4], index: 5, kind: input, shape index: {}]   ;;  %s1352_s6 = inlined_call_operand.vmem [shape: f32[16,1], index: 6, kind: input, shape index: {}]   ;;  %s1353_s7 = inlined_call_operand.hbm [shape: f32[2,16,256], index: 7, kind: output, shape index: {}]  }
   0x1   :  { %14 = vsyncpa [#allocation3 + $0x1], 0 }
   0x2   :  { %15 = vsyncpa [#allocation4], 0 }
   0x3   :  { %17 = vsyncpa [#allocation4 + $0x1], 0  ;;  %s1115_s24 = smov 0   ;;  %s1117_s25 = smov 0  }
   0x4   :  { %s1119_s26 = smov 0   ;;  %s1121_s27 = smov 0  }
   0x5 LB: > { %s1136_s28 = sadd.s32 4294967295, %s1063_s27   ;;  %s871_s29 = sadd.s32 4294967294, %s1063_s27   ;;  %s1063_s27 = sphi %s1121_s27, %s1366_s27   ;;  %s1059_s26 = sphi %s1119_s26, %s1365_s26   ;;  %s1055_s25 = sphi %s1117_s25, %s1364_s25   ;;  %s1051_s24 = sphi %s1115_s24, %s1363_s24  }
   0x6   : > { %s1140_s30 = sadd.s32 1, %s1063_s27   ;;  %s30_s8 = sadd.s32 1, %s1059_s26 }
   0x7   : > { %s27_s9 = ssub.s32 %s1063_s27, %s1140_s30  ;;  %p37_p0 = scmp.ne.s32.totalorder %s1059_s26, %s1055_s25 }
   0x8   : > { %p28_p1 = scmp.eq.s32.totalorder %s27_s9, 0  ;;  %p38_p2 = scmp.eq.s32.totalorder %s1063_s27, 0 }
   0x9   : > { %p43_p3 = scmp.ne.s32.totalorder %s1055_s25, %s1051_s24  ;;  %p44_p4 = scmp.eq.s32.totalorder %s1136_s28, 0 }
   0xa   : > { %s1152_s10 = scalar_select %p28_p1, %s1059_s26, %s30_s8  }
   0xb   : > { %p1154_p5 = por %p38_p2, %p37_p0  ;;  %p1158_p6 = por %p44_p4, %p43_p3 }
   0xc   : > { %p193_p7 = scmp.eq.s32.totalorder %s1136_s28, 1  ;;  %p199_p8 = scmp.eq.s32.totalorder %s871_s29, 1 }
   0xd   : > { %p923_p10 = scmp.lt.s32.totalorder %s1063_s27, 2  ;;  %s237_s15 = sand.u32 1, %s1059_s26  }
   0xe   : > { %p1165_p11 = por %p193_p7, %p37_p0  ;;  %p1169_p12 = por %p199_p8, %p43_p3 }
   0xf   : > { %s901_s16 = sshll.u32 %s1063_s27, 9  ;;  %s874_s17 = sshll.u32 %s237_s15, 5 }
  0x10   : > { %s1357_s13 = scalar_select %p1165_p11, 1, 0 }
  0x11   : > { %s1358_s14 = scalar_select %p1169_p12, 1, 0 }
  0x12   : > { %s1178_s20 = scalar_lea.hbm %s1346_s0, %s901_s16  ;;  %s241_s21 = scalar_lea.vmem [#allocation2], %s874_s17 }
  0x13   : > { %s248_s22 = sshll.u32 %s241_s21, 4  ;;  %p1182_p13 = pnand %p923_p10, %p1154_p5  ;;  %s1186_s22 = int_to_ptr.vmem [resolvable:$true] %s248_s22 }
  0x14   : > { %s1188_s29 = scalar_lea.sflag [#allocation3], %s237_s15  ;;  %s967_s8 = scalar_lea.hbm %s1178_s20, 512 }
  0x15   : > { %p968_p0 = scmp.ne.s32.totalorder %s1178_s20, %s967_s8  ;;  %p969_p1 = pneg %p1182_p13 }
  0x16   : > { %s972_s16 = scalar_lea.hbm %s1346_s0, 1024  ;;  %p973_p4 = scmp.lt.u32.totalorder %s1178_s20, %s1346_s0 }
  0x17   : > { %p970_p2 = pnand %p969_p1, %p968_p0  ;;  %p974_p5 = scmp.lt.u32.totalorder %s972_s16, %s967_s8 }
  0x18   : > { %p976_p8 = scmp.lt.u32.totalorder %s967_s8, %s1178_s20 }
  0x19   : > { %p971_p3 = pneg %p970_p2  ;;  %p975_p7 = por %p974_p5, %p973_p4 }
  0x1b   : > { %p977_p10 = por %p976_p8, %p975_p7 }
  0x1d   : > { %p978_p9 = pnand %p977_p10, %p971_p3 }
  0x1f   : > { %981 = shalt.err (!%p978_p9)
}
  0x20   : > { %s982_s15 = scalar_lea.vmem %s1186_s22, 512  ;;  %s1065_s19 = smov [#allocation2]  }
  0x21   : > { %p983_p0 = scmp.ne.s32.totalorder %s1186_s22, %s982_s15  ;;  %s987_s21 = sshll.u32 %s1065_s19, 4  ;;  %s988_s21 = int_to_ptr.vmem [resolvable:$false] %s987_s21 }
  0x22   : > { %s989_s9 = scalar_lea.vmem %s988_s21, 1024  ;;  %p990_p11 = scmp.lt.s32.totalorder %s1186_s22, %s988_s21 }
  0x23   : > { %p985_p2 = pnand %p983_p0, %p969_p1  ;;  %p991_p4 = scmp.lt.s32.totalorder %s989_s9, %s982_s15 }
  0x25   : > { %p986_p12 = pneg %p985_p2  ;;  %p992_p5 = por %p991_p4, %p990_p11 }
  0x27   : > { %p993_p7 = pnand %p992_p5, %p986_p12 }
  0x29   : > { %996 = shalt.err (!%p993_p7)
}
  0x2a   : > { %s1066_s8 = smov 256   ;;  %s1067_s11 = smov 16  }
  0x2b   : > { %918 = dma.hbm_to_vmem [thread:$0]  (!%p1182_p13), %s1178_s20, 512, %s1186_s22, %s1188_s29, %s1066_s8, %s1066_s8, %s1067_s11  }
  0x2c   : > { %p877_p9 = scmp.ge.s32.totalorder %s1063_s27, 1  ;;  %p256_p1 = scmp.lt.s32.totalorder %s1063_s27, 3 }
  0x2e   : > { %p257_p3 = pnand %p877_p9, %p256_p1 }
  0x2f   : > { %s1219_s16 = sand.u32 (!%p257_p3), 1, %s1055_s25  }
  0x30   : > { %260 = sbr.rel (%p257_p3) target bundleno = 863 (0x35f), region = 48  ;;  %s878_s17 = sshll.u32 (!%p257_p3), %s1219_s16, 5 }
  0x31   : > { %s263_s18 = scalar_lea.sflag (!%p257_p3), [#allocation3], %s1219_s16  ;;  %s266_s15 = scalar_lea.vmem (!%p257_p3), [#allocation2], %s878_s17 }
  0x37   : > { %1042 = dma.done.wait (%p1158_p6), %s263_s18, 512  }
  0x38   : > { %1044 = vsyncadd (%p1158_p6), %s263_s18, 4294966784  ;;  %v1068_v0 = vmov 0.0   ;;  %v1069_v1 = vmov 0   ;;  %v1231_v2 = vld [vmem:[%s266_s15 + $0x8] sm:$0xff]  ;;  %v1233_v3 = vld [vmem:[%s266_s15 + $0x18] sm:$0xff]  ;;  %vm308_vm0 = vcmask 130048   ;;  %v385_v21 = vlaneseq }
  0x39   : > { %376 = vmatprep.mubr.f32.mxu0 %v1068_v0  ;;  %965 = vset.pattern.permute.xlu0 %v1069_v1  ;;  %v1235_v4 = vld [vmem:[%s266_s15] sm:$0xff]  ;;  %v903_v5 = vpack.c.bf16 %v1233_v3, %v1231_v2  ;;  %v1239_v6 = vld [vmem:[%s266_s15 + $0x10] sm:$0xff]  ;;  %vm417_vm1 = vcmask 1043456   ;;  %s1070_s29 = smov 1   ;;  %vm413_vm2 = vcmask 31744   ;;  %s1071_s9 = smov 127  }
  0x3a   : > { %488 = vmatprep.mubr.f32.mxu1 %v1068_v0  ;;  %966 = vset.pattern.permute.xlu1 %v1069_v1  ;;  %v302_v7 = vld [vmem:[%s1348_s2] sm:$0xf]  ;;  %v905_v8 = vpack.c.bf16 %v1239_v6, %v1235_v4  ;;  %v881_v17 = vld [vmem:[%s1349_s3 + $0x4] sm:$0xf]  ;;  %v672_v20 = vld [vmem:[%s1352_s6 + $0x8] sm:$0xff]  ;;  %v386_v22 = vand.u32 127, %v385_v21 }
  0x3b   : > { %305 = vperm.xlu0 %965, %v302_v7   ;;  %904 = vmatprep.subr.bf16.mxu0 %v903_v5  ;;  %v301_v9 = vld [vmem:[%s1347_s1] sm:$0xf]  ;;  %v888_v35 = vld [vmem:[%s1349_s3 + $0x8] sm:$0xf]  ;;  %s296_s18 = scalar_lea.vmem [#allocation5], %s878_s17  ;;  %s902_s12 = sshll.u32 %s1136_s28, 9 }
  0x3c   : > { %906 = vmatpush1.bf16.msra.mxu0 %v905_v8  ;;  %v671_v18 = vld [vmem:[%s1352_s6] sm:$0xff]  ;;  %vm394_vm3 = vcmp.lt.s32.totalorder %v386_v22, 1  ;;  %vm388_vm4 = vcmp.eq.s32.totalorder %v386_v22, 0  ;;  %v387_v24 = vadd.s32 128, %v386_v22  ;;  %vm405_vm5 = vcmp.lt.s32.totalorder %v386_v22, 127  ;;  %v670_v44 = vld [vmem:[%s1351_s5 + $0x8] sm:$0xff]  ;;  %s1302_s22 = scalar_lea.hbm %s1353_s7, %s902_s12 }
  0x3d   : > { %v659_v19 = vld [vmem:[%s1350_s4] sm:$0xf]  ;;  %s798_s15 = sshll.u32 %s296_s18, 4  ;;  %s785_s28 = scalar_lea.sflag [#allocation4], %s1219_s16  ;;  %s1296_s15 = int_to_ptr.vmem [resolvable:$true] %s798_s15 }
  0x3e   : > { %v410_v28 = vld [vmem:[%s1349_s3] sm:$0xf]  ;;  %vm400_vm6 = vcmp.eq.s32.totalorder %v387_v24, 255  ;;  %s997_s23 = scalar_lea.vmem %s1296_s15, 512  ;;  %p1360_p11 = scmp.ne.s32.totalorder %s1357_s13, 0 }
  0x3f   : > { %880 = vmatmul.mubr.msk.f32.vlgmr.msra.gmra.mrb[0].mxu0 %vm308_vm0, %v301_v9  ;;  %v669_v43 = vld [vmem:[%s1351_s5] sm:$0xff]  ;;  %p998_p6 = scmp.ne.s32.totalorder %s1296_s15, %s997_s23 }
  0x40   : > { %759 = vmatprep.mubr.f32.mxu0 %v1068_v0 }
  0x41   : > { %p999_p12 = pnand %p998_p6, %p1360_p11 }
  0x43   : > { %p1000_p13 = pneg %p999_p12 }
  0xba   : > { %v306_v10 = vpop.permute.xlu0 %305 }
 0x112   : > { %v378_v11 = vpop.f32.mrb[0].mxu0 }
 0x113   : > { %v379_v12 = vadd.f32 %v378_v11, %v306_v10  ;;  %v380_v13 = vpop.f32.mrb[1].mxu0 }
 0x114   : > { %v381_v14 = vadd.f32 %v380_v13, %v306_v10 }
 0x115   : > { %v383_v15 = vmax.f32 %v379_v12, 0.0 }
 0x116   : > { %v384_v16 = vmax.f32 %v381_v14, 0.0 }
 0x117   : > { %390 = vrot.lane.b32.xlu0 %v383_v15, %s1070_s29 }
 0x118   : > { %392 = vrot.lane.b32.xlu1 %v384_v16, %s1070_s29  ;;  %882 = vmatprep.subr.msk.mxu1 %vm417_vm1, %v384_v16  ;;  %s1072_s29 = smov [#allocation5]  }
 0x119   : > { %883 = vmatpush1.msk.msra.mxu1 %vm417_vm1, %v383_v15  ;;  %s1001_s19 = sshll.u32 %s1072_s29, 4  ;;  %s1002_s19 = int_to_ptr.vmem [resolvable:$false] %s1001_s19 }
 0x11a   : > { %884 = vmatmul.mubr.msk.f32.vlgmr.msra.gmra.mrb[0].mxu1 %vm413_vm2, %v881_v17  ;;  %s1003_s21 = scalar_lea.vmem %s1002_s19, 1024  ;;  %p1004_p8 = scmp.lt.s32.totalorder %s1296_s15, %s1002_s19 }
 0x11b   : > { %403 = vrot.lane.b32.xlu0 %v384_v16, %s1071_s9  ;;  %568 = vmatprep.mubr.f32.mxu1 %v1068_v0  ;;  %p1005_p10 = scmp.lt.s32.totalorder %s1003_s21, %s997_s23 }
 0x11c   : > { %401 = vrot.lane.b32.xlu1 %v383_v15, %s1071_s9 }
 0x11d   : > { %p1006_p0 = por %p1005_p10, %p1004_p8 }
 0x11f   : > { %675 = vperm.xlu0 %965, %v671_v18   ;;  %p1007_p2 = pnand %p1006_p0, %p1000_p13 }
 0x120   : > { %662 = vperm.xlu1 %966, %v659_v19  }
 0x124   : > { %680 = vperm.xlu1 %966, %v672_v20  }
 0x189   : > { %v391_v23 = vpop.permute.xlu0 %390 }
 0x18a   : > { %v393_v25 = vpop.permute.xlu1 %392 }
 0x18b   : > { %v395_v26 = vsel %vm394_vm3, %v391_v23, %v393_v25  ;;  %v396_v27 = vsel %vm394_vm3, %v393_v25, %v391_v23 }
 0x18c   : > { %v397_v29 = vsel %vm388_vm4, 0.0, %v396_v27  ;;  %885 = vmatprep.subr.msk.mxu1 %vm417_vm1, %v395_v26 }
 0x18d   : > { %v404_v30 = vpop.permute.xlu0 %403  ;;  %886 = vmatpush1.msk.msra.mxu1 %vm417_vm1, %v397_v29 }
 0x18e   : > { %v402_v31 = vpop.permute.xlu1 %401  ;;  %887 = vmatmul.mubr.msk.f32.vlgmr.msra.gmra.mrb[0].mxu1 %vm413_vm2, %v410_v28 }
 0x18f   : > { %v407_v32 = vsel %vm405_vm5, %v404_v30, %v402_v31  ;;  %650 = vmatprep.mubr.f32.mxu1 %v1068_v0  ;;  %v406_v34 = vsel %vm405_vm5, %v402_v31, %v404_v30 }
 0x190   : > { %v409_v33 = vsel %vm400_vm6, 0.0, %v407_v32 }
 0x191   : > { %889 = vmatprep.subr.msk.mxu1 %vm417_vm1, %v409_v33 }
 0x192   : > { %890 = vmatpush1.msk.msra.mxu1 %vm417_vm1, %v406_v34 }
 0x196   : > { %891 = vmatmul.mubr.msk.f32.vlgmr.msra.gmra.mrb[0].mxu1 %vm413_vm2, %v888_v35 }
 0x19e   : > { %v676_v45 = vpop.permute.xlu0 %675 }
 0x19f   : > { %v663_v36 = vpop.permute.xlu1 %662 }
 0x1a3   : > { %v681_v51 = vpop.permute.xlu1 %680 }
 0x269   : > { %v652_v37 = vpop.f32.mrb[0].mxu1 }
 0x26a   : > { %v665_v38 = vadd.f32 %v663_v36, %v652_v37  ;;  %v654_v39 = vpop.f32.mrb[1].mxu1 }
 0x26b   : > { %v666_v40 = vadd.f32 %v663_v36, %v654_v39 }
 0x26c   : > { %v667_v42 = vmax.f32 %v665_v38, 0.0 }
 0x26d   : > { %v668_v41 = vmax.f32 %v666_v40, 0.0 }
 0x26f   : > { %892 = vmatprep.subr.msk.mxu0 %vm417_vm1, %v668_v41 }
 0x270   : > { %893 = vmatpush1.msk.msra.mxu0 %vm417_vm1, %v667_v42 }
 0x271   : > { %894 = vmatmul.mubr.msk.f32.vlgmr.msra.gmra.mrb[2].mxu0 %vm413_vm2, %v669_v43 }
 0x272   : > { %765 = vmatprep.mubr.f32.mxu0 %v1068_v0 }
 0x275   : > { %895 = vmatmul.mubr.msk.f32.gmra.mrb[4].mxu0 %vm413_vm2, %v670_v44 }
 0x344   : > { %v761_v46 = vpop.f32.mrb[2].mxu0 }
 0x345   : > { %v762_v47 = vadd.f32 %v761_v46, %v676_v45  ;;  %v763_v48 = vpop.f32.mrb[3].mxu0 }
 0x346   : > { %v764_v49 = vadd.f32 %v763_v48, %v676_v45 }
 0x347   : > { %v772_v50 = vadd.f32 %v762_v47, %v1235_v4 }
 0x348   : > { %v773_v52 = vadd.f32 %v764_v49, %v1231_v2  ;;  %v767_v53 = vpop.f32.mrb[4].mxu0 }
 0x349   : > { %v776_v54 = vmax.f32 %v772_v50, 0.0  ;;  %v768_v55 = vadd.f32 %v767_v53, %v681_v51  ;;  %v769_v56 = vpop.f32.mrb[5].mxu0 }
 0x34a   : > { %v777_v57 = vmax.f32 %v773_v52, 0.0  ;;  %v770_v58 = vadd.f32 %v769_v56, %v681_v51 }
 0x34b   : > { %780 = vst [vmem:[%s296_s18] sm:$0xff] %v776_v54  ;;  %v774_v59 = vadd.f32 %v768_v55, %v1239_v6 }
 0x34c   : > { %781 = vst [vmem:[%s296_s18 + $0x8] sm:$0xff] %v777_v57  ;;  %v775_v60 = vadd.f32 %v770_v58, %v1233_v3 }
 0x34d   : > { %v778_v61 = vmax.f32 %v774_v59, 0.0 }
 0x34e   : > { %v779_v62 = vmax.f32 %v775_v60, 0.0 }
 0x34f   : > { %782 = vst [vmem:[%s296_s18 + $0x10] sm:$0xff] %v778_v61 }
 0x350   : > { %783 = vst [vmem:[%s296_s18 + $0x18] sm:$0xff] %v779_v62 }
 0x351   : > { %1010 = shalt.err (!%p1007_p2)
}
 0x352   : > { %s1011_s9 = scalar_lea.hbm %s1302_s22, 512  ;;  %s1015_s18 = scalar_lea.hbm %s1353_s7, 1024 }
 0x353   : > { %p1012_p4 = scmp.ne.s32.totalorder %s1302_s22, %s1011_s9  ;;  %p1016_p9 = scmp.lt.u32.totalorder %s1302_s22, %s1353_s7 }
 0x354   : > { %p1017_p1 = scmp.lt.u32.totalorder %s1015_s18, %s1011_s9  ;;  %p1019_p6 = scmp.lt.u32.totalorder %s1011_s9, %s1302_s22 }
 0x355   : > { %p1013_p5 = pnand %p1012_p4, %p1360_p11 }
 0x356   : > { %p1018_p3 = por %p1017_p1, %p1016_p9 }
 0x357   : > { %p1014_p7 = pneg %p1013_p5 }
 0x358   : > { %p1020_p12 = por %p1019_p6, %p1018_p3 }
 0x35a   : > { %p1021_p13 = pnand %p1020_p12, %p1014_p7 }
 0x35c   : > { %1024 = shalt.err (!%p1021_p13)
}
 0x35d   : > { %s1073_s20 = smov 256   ;;  %s1074_s23 = smov 16  }
 0x35e   : > { %913 = dma.vmem_to_hbm [thread:$0]  (%p1360_p11), %s1296_s15, 512, %s1302_s22, %s785_s28, %s1073_s20, %s1073_s20, %s1074_s23  }
 0x35f PF: > { %s813_s29 = sand.u32 1, %s1051_s24   ;;  %p1361_p8 = scmp.ne.s32.totalorder %s1358_s14, 0 }
 0x360   : > { %p1362_p10 = scmp.ge.s32.totalorder %s1063_s27, 2  ;;  %s814_s19 = scalar_lea.sflag [#allocation4], %s813_s29 }
 0x362   : > { %p920_p0 = pnand %p1362_p10, %p1361_p8 }
 0x364   : > { %1046 = dma.done.wait (!%p920_p0), %s814_s19, 512  }
 0x365   : > { %1048 = vsyncadd (!%p920_p0), %s814_s19, 4294966784  ;;  %p20_p2 = scmp.ge.s32.totalorder %s1140_s30, 4   ;;  %s1363_s24 = smov %s1055_s25 }
 0x366   : > { %s1364_s25 = smov %s1059_s26  ;;  %s1365_s26 = smov %s1152_s10 }
 0x367   : > { %s1366_s27 = smov %s1140_s30  ;;  %22 = sbr.rel (!%p20_p2) target bundleno = 5 (0x5), region = 95 }
 0x36e   :  { %819 = vsyncpa [#allocation3], 1 }
 0x36f   :  { %821 = vsyncpa [#allocation3 + $0x1], 1 }
 0x370   :  { %822 = vsyncpa [#allocation4], 1 }
 0x371   :  { %824 = vsyncpa [#allocation4 + $0x1], 1 }

</bundles_post_ra>
